<compile_context>
chip_gen: v5e
topology: v5e:2x2
jax: 0.10.0
libtpu: 0.0.40
codegen_flags: <defaults>
</compile_context>

<pallas_src>
import functools
import math

import jax
import jax.numpy as jnp
from jax.experimental import pallas as pl
from jax.experimental.pallas import tpu as pltpu


def _round_up(a, b):
    return (a + b - 1) // b * b


def _vmem_capacity_bytes():
    """Per-core VMEM capacity; conservative fallback if the query is unavailable."""
    try:
        return int(pltpu.get_tpu_info().vmem_capacity_bytes)
    except Exception:
        return 64 * 1024 * 1024  # v7x per-TensorCore physical VMEM (smallest of v5e/v6e/v7x)


# ---------------------------------------------------------------------------
# Kernel
# ---------------------------------------------------------------------------
def _patch_embed3d_kernel(x_ref, gamma_ref, beta_ref, o_ref, *scratch,
                          eps, use_norm, group):
    # x_ref:     (1, C, T)   block of (B, C, N)   -- token axis is lane-dense
    # gamma_ref: (C, 1) f32
    # beta_ref:  (C, 1) f32
    # o_ref:     (1, T, C)               if group == 1
    #            (1, T//group, group*C)  if group  > 1 (lane-packed output rows)
    # scratch:   ()                      if group == 1
    #            (pack_ref,) VMEM (T, C) in output dtype, used to repack lanes
    x = x_ref[0]                                            # (C, T)

    if use_norm:
        # LayerNorm over C in (C, T) layout: reductions run over sublanes, all VALU work
        # stays on lane-dense (C, T) vregs.  One-pass statistics (single traversal of xf):
        # var = E[x^2] - E[x]^2 (biased, matching PyTorch), f32 accumulation, clamped >= 0.
        xf = x.astype(jnp.float32)
        mean = jnp.mean(xf, axis=0, keepdims=True)           # (1, T)
        mean_sq = jnp.mean(xf * xf, axis=0, keepdims=True)   # (1, T)
        var = jnp.maximum(mean_sq - mean * mean, 0.0)        # guard tiny cancellation
        inv_std = jax.lax.rsqrt(var + eps)                   # (1, T)
        out = (xf - mean) * inv_std * gamma_ref[...] + beta_ref[...]
    else:
        # Pure transpose path: no f32 round-trip.
        out = x

    out_t = out.astype(o_ref.dtype).T                        # (T, C) -- single XLU transpose

    if group == 1:
        # C is already lane-aligned (or packing disabled): store directly.
        o_ref[0] = out_t
    else:
        # Repack to (group*C)-lane-dense rows:
        #   packed[q, p*C + c] = out_t[q*group + p, c]
        # via a VMEM scratch + sublane-strided ref reads, then one dense store.
        pack_ref, = scratch
        pack_ref[...] = out_t                                 # (T, C) scratch in VMEM
        q = pack_ref.shape[0] // group
        pieces = [pack_ref[pl.ds(p, q, stride=group), :] for p in range(group)]
        o_ref[0] = jnp.concatenate(pieces, axis=-1)           # (T//group, group*C)


# ---------------------------------------------------------------------------
# Wrapper
# ---------------------------------------------------------------------------
def patch_embed3d(x, gamma=None, beta=None, *, use_norm=True, eps=1e-5,
                  max_tile_n=16 * 1024, core_parallel=False):
    """x: (B, C, D, H, W) -> (B, D*H*W, C), optionally LayerNorm'd over C."""
    B, C, D, H, W = x.shape
    N = D * H * W
    x_flat = x.reshape(B, C, N)                               # glue: flatten(2)

    out_dtype = x.dtype
    in_item = jnp.dtype(x.dtype).itemsize
    out_item = jnp.dtype(out_dtype).itemsize

    if gamma is None:
        gamma = jnp.ones((C,), dtype=jnp.float32)
    if beta is None:
        beta = jnp.zeros((C,), dtype=jnp.float32)
    gamma_col = jnp.asarray(gamma, dtype=jnp.float32).reshape(C, 1)
    beta_col = jnp.asarray(beta, dtype=jnp.float32).reshape(C, 1)

    # ---- lane-dense output packing: g = lcm(C, 128) / C tokens per lcm(C, 128)-lane row ----
    group_cand = 1
    if C % 128 != 0:
        width_cand = (C * 128) // math.gcd(C, 128)            # lcm(C, 128)
        g = width_cand // C
        if width_cand <= 1024 and N % g == 0:
            group_cand = g

    # ---- VMEM budget model (per token, bytes), accounting for double buffers + temps ----
    c_sub = _round_up(C, 8)        # (C, T)-oriented buffers: C on sublanes
    c_lane = _round_up(C, 128)     # (T, C)-oriented buffers: C on (padded) lanes
    per_token = 2 * c_sub * in_item                           # input double-buffer
    if group_cand > 1:
        per_token += 2 * C * out_item                         # packed output double-buffer
        per_token += c_lane * out_item                        # pack scratch (T, C)
    else:
        per_token += 2 * c_lane * out_item                    # unpacked output double-buffer
    per_token += c_lane * out_item                            # out_t temporary
    if use_norm:
        per_token += 3 * c_sub * 4                            # xf / centered / scaled f32 temps

    vmem_cap = _vmem_capacity_bytes()                         # 128 MiB v5e/v6e, 64 MiB v7x
    vmem_limit = max(32 * 1024 * 1024, (vmem_cap * 3) // 4)   # scoped VMEM limit (75% of phys)
    budget = vmem_cap // 2                                    # footprint target (headroom)

    # ---- tile_n selection: bandwidth-sized, VMEM-capped, NOT required to divide N ----
    align = max(128, 8 * group_cand)
    cap_tokens = max(align, (budget // per_token) // align * align)
    tile_n = min(max_tile_n, cap_tokens, _round_up(N, 128))
    tile_n = max(align, (tile_n // align) * align)

    group = group_cand if (group_cand > 1 and tile_n % (8 * group_cand) == 0) else 1
    width = group * C

    grid_n = pl.cdiv(N, tile_n)                               # ragged tail handled by masking

    if group > 1:
        out_shape = jax.ShapeDtypeStruct((B, N // group, width), out_dtype)
        out_spec = pl.BlockSpec((1, tile_n // group, width), lambda b, n: (b, n, 0))
        scratch_shapes = [pltpu.VMEM((tile_n, C), out_dtype)]
    else:
        out_shape = jax.ShapeDtypeStruct((B, N, C), out_dtype)
        out_spec = pl.BlockSpec((1, tile_n, C), lambda b, n: (b, n, 0))
        scratch_shapes = []

    kernel = functools.partial(_patch_embed3d_kernel,
                               eps=eps, use_norm=use_norm, group=group)

    # Token-tile axis can be sharded across the two TensorCores on v7x.
    n_axis_sem = pltpu.CORE_PARALLEL if core_parallel else pltpu.PARALLEL
    dims = (pltpu.PARALLEL, n_axis_sem)

    out = pl.pallas_call(
        kernel,
        out_shape=out_shape,
        grid_spec=pltpu.PrefetchScalarGridSpec(
            num_scalar_prefetch=0,
            grid=(B, grid_n),
            in_specs=[
                # Default double-buffering (review: deeper buffering buys nothing for a
                # copy-bound kernel and costs VMEM on v7x).
                pl.BlockSpec((1, C, tile_n), lambda b, n: (b, 0, n)),
                pl.BlockSpec((C, 1), lambda b, n: (0, 0)),
                pl.BlockSpec((C, 1), lambda b, n: (0, 0)),
            ],
            out_specs=out_spec,
            scratch_shapes=scratch_shapes,
        ),
        compiler_params=pltpu.CompilerParams(
            dimension_semantics=dims,
            vmem_limit_bytes=int(vmem_limit),
        ),
    )(x_flat, gamma_col, beta_col)

    if group > 1:
        out = out.reshape(B, N, C)                            # free: same bytes, row-major
    return out


# ---------------------------------------------------------------------------
# Pure-JAX reference
# ---------------------------------------------------------------------------
def _reference(x, gamma, beta, *, use_norm=True, eps=1e-5):
    B, C = x.shape[0], x.shape[1]
    xt = jnp.transpose(x.reshape(B, C, -1), (0, 2, 1))        # (B, N, C)
    if not use_norm:
        return xt
    xt = xt.astype(jnp.float32)
    mean = jnp.mean(xt, axis=-1, keepdims=True)
    var = jnp.mean((xt - mean) ** 2, axis=-1, keepdims=True)
    y = (xt - mean) * jax.lax.rsqrt(var + eps) * gamma + beta
    return y.astype(x.dtype)


if __name__ == "__main__":
    key = jax.random.PRNGKey(0)
    k1, k2, k3, k4, k5, k6 = jax.random.split(key, 6)

    # --- Test 1: small config, C=32 (lane-packed output, group=4), LayerNorm path ---
    B, C, D, H, W = 2, 32, 8, 8, 8
    x = jax.random.normal(k1, (B, C, D, H, W), dtype=jnp.float32)
    gamma = jax.random.normal(k2, (C,), dtype=jnp.float32)    # non-trivial affine params
    beta = jax.random.normal(k3, (C,), dtype=jnp.float32)

    out = jax.block_until_ready(patch_embed3d(x, gamma, beta, use_norm=True))
    ref = _reference(x, gamma, beta, use_norm=True)
    assert out.shape == (B, D * H * W, C), out.shape
    assert jnp.allclose(out, ref, atol=3e-5, rtol=3e-5), "mismatch vs reference (norm path)"

    # --- Test 2: norm_layer=None path (pure flatten + transpose) ---
    out_nn = jax.block_until_ready(patch_embed3d(x, use_norm=False))
    ref_nn = _reference(x, gamma, beta, use_norm=False)
    assert out_nn.shape == (B, D * H * W, C), out_nn.shape
    assert jnp.allclose(out_nn, ref_nn), "mismatch vs reference (no-norm path)"

    # --- Test 3: ragged N (not a multiple of 128, exercises masked tail tile) with the
    #     module's default embed_dim C=96 (generalized lcm(96,128)=384 lane packing). ---
    B2, C2, D2, H2, W2 = 1, 96, 5, 8, 8                       # N = 320
    x2 = jax.random.normal(k4, (B2, C2, D2, H2, W2), dtype=jnp.float32)
    gamma2 = jax.random.normal(k5, (C2,), dtype=jnp.float32)
    beta2 = jax.random.normal(k6, (C2,), dtype=jnp.float32)
    out2 = jax.block_until_ready(
        patch_embed3d(x2, gamma2, beta2, use_norm=True, max_tile_n=256))
    ref2 = _reference(x2, gamma2, beta2, use_norm=True)
    assert out2.shape == (B2, D2 * H2 * W2, C2), out2.shape
    assert jnp.allclose(out2, ref2, atol=3e-5, rtol=3e-5), "mismatch vs reference (ragged/C=96)"

    print("KERNEL_OK")
</pallas_src>

<mosaic_0001>
module attributes {stable_mosaic.version = 11 : i64} {
  func.func @_patch_embed3d_kernel(%arg0: i32, %arg1: i32, %arg2: memref<1x32x512xf32, #tpu.memory_space<vmem>>, %arg3: memref<32x1xf32, #tpu.memory_space<vmem>>, %arg4: memref<32x1xf32, #tpu.memory_space<vmem>>, %arg5: memref<1x128x128xf32, #tpu.memory_space<vmem>>, %arg6: memref<512x32xf32, #tpu.memory_space<vmem>>) attributes {dimension_semantics = [#tpu.dimension_semantics<parallel>, #tpu.dimension_semantics<parallel>], iteration_bounds = array<i64: 2, 1>, scalar_prefetch = 0 : i64, scratch_operands = 1 : i64, tpu.core_type = #tpu.core_type<tc>, window_params = [{transform_indices = @transform_0, window_bounds = array<i64: 1, 32, 512>}, {pipeline_mode = #tpu.pipeline_mode<synchronous>, transform_indices = @transform_1, window_bounds = array<i64: 32, 1>}, {pipeline_mode = #tpu.pipeline_mode<synchronous>, transform_indices = @transform_2, window_bounds = array<i64: 32, 1>}, {transform_indices = @transform_3, window_bounds = array<i64: 1, 128, 128>}]} {
    %c0 = arith.constant 0 : index
    %c0_0 = arith.constant 0 : index
    %c0_1 = arith.constant 0 : index
    %0 = vector.load %arg2[%c0, %c0_0, %c0_1] : memref<1x32x512xf32, #tpu.memory_space<vmem>>, vector<1x32x512xf32>
    %1 = vector.shape_cast %0 : vector<1x32x512xf32> to vector<32x512xf32>
    %cst = arith.constant dense<0.000000e+00> : vector<512xf32>
    %2 = vector.multi_reduction <add>, %1, %cst [0] : vector<32x512xf32> to vector<512xf32>
    %3 = vector.shape_cast %2 : vector<512xf32> to vector<1x512xf32>
    %cst_2 = arith.constant 3.200000e+01 : f32
    %4 = vector.broadcast %cst_2 : f32 to vector<1x512xf32>
    %5 = arith.divf %3, %4 : vector<1x512xf32>
    %6 = arith.mulf %1, %1 : vector<32x512xf32>
    %cst_3 = arith.constant dense<0.000000e+00> : vector<512xf32>
    %7 = vector.multi_reduction <add>, %6, %cst_3 [0] : vector<32x512xf32> to vector<512xf32>
    %8 = vector.shape_cast %7 : vector<512xf32> to vector<1x512xf32>
    %cst_4 = arith.constant 3.200000e+01 : f32
    %9 = vector.broadcast %cst_4 : f32 to vector<1x512xf32>
    %10 = arith.divf %8, %9 : vector<1x512xf32>
    %11 = arith.mulf %5, %5 : vector<1x512xf32>
    %12 = arith.subf %10, %11 : vector<1x512xf32>
    %cst_5 = arith.constant 0.000000e+00 : f32
    %13 = vector.broadcast %cst_5 : f32 to vector<1x512xf32>
    %14 = arith.maximumf %12, %13 : vector<1x512xf32>
    %cst_6 = arith.constant 9.99999974E-6 : f32
    %15 = vector.broadcast %cst_6 : f32 to vector<1x512xf32>
    %16 = arith.addf %14, %15 : vector<1x512xf32>
    %17 = math.rsqrt %16 : vector<1x512xf32>
    %18 = vector.broadcast %5 : vector<1x512xf32> to vector<32x512xf32>
    %19 = arith.subf %1, %18 : vector<32x512xf32>
    %20 = vector.broadcast %17 : vector<1x512xf32> to vector<32x512xf32>
    %21 = arith.mulf %19, %20 : vector<32x512xf32>
    %c0_7 = arith.constant 0 : index
    %c0_8 = arith.constant 0 : index
    %22 = vector.load %arg3[%c0_7, %c0_8] : memref<32x1xf32, #tpu.memory_space<vmem>>, vector<32x1xf32>
    %23 = vector.broadcast %22 : vector<32x1xf32> to vector<32x512xf32>
    %24 = arith.mulf %21, %23 : vector<32x512xf32>
    %c0_9 = arith.constant 0 : index
    %c0_10 = arith.constant 0 : index
    %25 = vector.load %arg4[%c0_9, %c0_10] : memref<32x1xf32, #tpu.memory_space<vmem>>, vector<32x1xf32>
    %26 = vector.broadcast %25 : vector<32x1xf32> to vector<32x512xf32>
    %27 = arith.addf %24, %26 : vector<32x512xf32>
    %28 = tpu.transpose %27, [1, 0] : vector<32x512xf32> -> vector<512x32xf32>
    %c0_11 = arith.constant 0 : index
    %c0_12 = arith.constant 0 : index
    %29 = vector.load %arg6[%c0_11, %c0_12] : memref<512x32xf32, #tpu.memory_space<vmem>>, vector<512x32xf32>
    tpu.vector_store %arg6[%c0_11, %c0_12], %28 {strides = array<i32>} : memref<512x32xf32, #tpu.memory_space<vmem>>, vector<512x32xf32>,
    %c0_13 = arith.constant 0 : index
    %c0_14 = arith.constant 0 : index
    %30 = tpu.strided_load %arg6[%c0_13, %c0_14] {strides = array<i32: 4, 1>} : memref<512x32xf32, #tpu.memory_space<vmem>>, vector<128x32xf32>
    %c1 = arith.constant 1 : index
    %c0_15 = arith.constant 0 : index
    %31 = tpu.strided_load %arg6[%c1, %c0_15] {strides = array<i32: 4, 1>} : memref<512x32xf32, #tpu.memory_space<vmem>>, vector<128x32xf32>
    %c2 = arith.constant 2 : index
    %c0_16 = arith.constant 0 : index
    %32 = tpu.strided_load %arg6[%c2, %c0_16] {strides = array<i32: 4, 1>} : memref<512x32xf32, #tpu.memory_space<vmem>>, vector<128x32xf32>
    %c3 = arith.constant 3 : index
    %c0_17 = arith.constant 0 : index
    %33 = tpu.strided_load %arg6[%c3, %c0_17] {strides = array<i32: 4, 1>} : memref<512x32xf32, #tpu.memory_space<vmem>>, vector<128x32xf32>
    %34 = tpu.concatenate %30, %31, %32, %33 in 1 : vector<128x32xf32>, vector<128x32xf32>, vector<128x32xf32>, vector<128x32xf32> -> vector<128x128xf32>
    %c0_18 = arith.constant 0 : index
    %c0_19 = arith.constant 0 : index
    %c0_20 = arith.constant 0 : index
    %35 = vector.load %arg5[%c0_18, %c0_19, %c0_20] : memref<1x128x128xf32, #tpu.memory_space<vmem>>, vector<1x128x128xf32>
    %36 = vector.shape_cast %35 : vector<1x128x128xf32> to vector<128x128xf32>
    %37 = vector.shape_cast %34 : vector<128x128xf32> to vector<1x128x128xf32>
    tpu.vector_store %arg5[%c0_18, %c0_19, %c0_20], %37 {strides = array<i32>} : memref<1x128x128xf32, #tpu.memory_space<vmem>>, vector<1x128x128xf32>,
    return
  }
  func.func @transform_0(%arg0: i32, %arg1: i32) -> (i32, i32, i32) {
    %c0_i32 = arith.constant 0 : i32
    %c0_i32_0 = arith.constant 0 : i32
    return %arg0, %c0_i32, %arg1 : i32, i32, i32
  }
  func.func @transform_1(%arg0: i32, %arg1: i32) -> (i32, i32) {
    %c0_i32 = arith.constant 0 : i32
    %c0_i32_0 = arith.constant 0 : i32
    %c0_i32_1 = arith.constant 0 : i32
    return %c0_i32, %c0_i32_0 : i32, i32
  }
  func.func @transform_2(%arg0: i32, %arg1: i32) -> (i32, i32) {
    %c0_i32 = arith.constant 0 : i32
    %c0_i32_0 = arith.constant 0 : i32
    %c0_i32_1 = arith.constant 0 : i32
    return %c0_i32, %c0_i32_0 : i32, i32
  }
  func.func @transform_3(%arg0: i32, %arg1: i32) -> (i32, i32, i32) {
    %c0_i32 = arith.constant 0 : i32
    %c0_i32_0 = arith.constant 0 : i32
    return %arg0, %arg1, %c0_i32 : i32, i32, i32
  }
}

</mosaic_0001>

<bundles_post_ra>
// kernel: tpu_custom_call.1
= control target key start
LH: loop header
LB: loop body
LE: loop exit
PB: predicated region body
PF: predicated region fallthrough
CT: control target
= control target key end

     0   :  { %8 = vsyncpa [#allocation4], 0  ;;  %s1947_s0 = inlined_call_operand.hbm [shape: f32[2,32,512], index: 0, kind: input, shape index: {}]   ;;  %s1948_s1 = inlined_call_operand.vmem [shape: f32[32,1], index: 1, kind: input, shape index: {}]   ;;  %s1949_s2 = inlined_call_operand.vmem [shape: f32[32,1], index: 2, kind: input, shape index: {}]   ;;  %s1950_s3 = inlined_call_operand.hbm [shape: f32[2,128,128], index: 3, kind: output, shape index: {}]  }
   0x1   :  { %10 = vsyncpa [#allocation4 + $0x1], 0 }
   0x2   :  { %11 = vsyncpa [#allocation5], 0 }
   0x3   :  { %13 = vsyncpa [#allocation5 + $0x1], 0  ;;  %s1426_s12 = smov 0   ;;  %s1428_s13 = smov 0  }
   0x4   :  { %s1430_s14 = smov 0   ;;  %s1432_s15 = smov 0  }
   0x5   :  { %s1434_s16 = smov 0   ;;  %s1436_s17 = smov 0  }
   0x6 LB: > { %s1181_s18 = sadd.s32 4294967295, %s1395_s17   ;;  %s1182_s19 = sadd.s32 4294967294, %s1395_s17   ;;  %s1395_s17 = sphi %s1436_s17, %s19_s17   ;;  %s1391_s16 = sphi %s1434_s16, %s1959_s16   ;;  %s1387_s15 = sphi %s1432_s15, %s1958_s15   ;;  %s1383_s14 = sphi %s1430_s14, %s1957_s14   ;;  %s1379_s13 = sphi %s1428_s13, %s1956_s13   ;;  %s1375_s12 = sphi %s1426_s12, %s1955_s12  }
   0x7   : > { %s31_s20 = sadd.s32 1, %s1391_s16  ;;  %s40_s21 = sadd.s32 1, %s1383_s14 }
   0x8   : > { %p33_p0 = scmp.ge.s32.totalorder %s31_s20, 2  ;;  %p47_p1 = scmp.ne.s32.totalorder %s1383_s14, %s1379_s13 }
   0x9   : > { %p48_p2 = scmp.eq.s32.totalorder %s1395_s17, 0  ;;  %p53_p3 = scmp.ne.s32.totalorder %s1379_s13, %s1375_s12 }
   0xa   : > { %s1961_s20 = smov (%p33_p0, %s31_s20), 0  ;;  %p54_p5 = scmp.eq.s32.totalorder %s1181_s18, 0 }
   0xb   : > { %p1467_p4 = por %p48_p2, %p47_p1  ;;  %s35_s23 = ssub.s32 %s1391_s16, %s1961_s20 }
   0xc   : > { %p121_p6 = scmp.eq.s32.totalorder %s1181_s18, 1  ;;  %p38_p7 = scmp.eq.s32.totalorder %s35_s23, 0 }
   0xd   : > { %p1473_p8 = por %p54_p5, %p53_p3  ;;  %p127_p10 = scmp.eq.s32.totalorder %s1182_s19, 1 }
   0xe   : > { %p1477_p9 = por %p121_p6, %p47_p1  ;;  %p1184_p12 = scmp.ge.s32.totalorder %s1395_s17, 2 }
   0xf   : > { %s1482_s26 = scalar_select %p38_p7, %s1383_s14, %s40_s21  }
  0x10   : > { %p1484_p11 = por %p127_p10, %p53_p3  ;;  %p1210_p13 = scmp.lt.s32.totalorder %s1395_s17, 2 }
  0x11   : > { %s153_s28 = sand.u32 1, %s1383_s14   ;;  %s1196_s30 = sshll.u32 %s1391_s16, 7 }
  0x12   : > { %s1185_s29 = sshll.u32 %s153_s28, 7  ;;  %s164_s6 = scalar_lea.hbm %s1947_s0, %s1196_s30 }
  0x13   : > { %s157_s7 = scalar_lea.vmem [#allocation3], %s1185_s29  ;;  %s165_s9 = sshll.u32 %s164_s6, 4  ;;  %s166_s9 = int_to_ptr.hbm [resolvable:$true] %s165_s9 }
  0x14   : > { %s167_s8 = sshll.u32 %s157_s7, 4  ;;  %p1203_p0 = pnand %p1210_p13, %p1467_p4  ;;  %s168_s8 = int_to_ptr.vmem [resolvable:$true] %s167_s8 }
  0x15   : > { %p1188_p1 = scmp.ge.s32.totalorder %s1395_s17, 1  ;;  %s154_s10 = scalar_lea.sflag [#allocation4], %s153_s28 }
  0x16   : > { %s1397_s11 = smov 512   ;;  %s1398_s18 = smov 32  }
  0x17   : > { %1205 = dma.hbm_to_vmem [thread:$0]  (!%p1203_p0), %s166_s9, 2048, %s168_s8, %s154_s10, %s1397_s11, %s1397_s11, %s1398_s18  }
  0x18   : > { %p175_p2 = scmp.lt.s32.totalorder %s1395_s17, 3 }
  0x1a   : > { %p176_p3 = pnand %p1188_p1, %p175_p2 }
  0x1b   : > { %s1500_s19 = sand.u32 (!%p176_p3), 1, %s1379_s13  }
  0x1c   : > { %179 = sbr.rel (%p176_p3) target bundleno = 791 (0x317), region = 32  ;;  %s1189_s21 = sshll.u32 (!%p176_p3), %s1500_s19, 7 }
  0x1d   : > { %s182_s23 = scalar_lea.sflag (!%p176_p3), [#allocation4], %s1500_s19  ;;  %s1506_s22 = scalar_lea.vmem (!%p176_p3), [#allocation3], %s1189_s21 }
  0x21   : > { %1366 = dma.done.wait (%p1473_p8), %s182_s23, 2048  }
  0x22   : > { %1368 = vsyncadd (%p1473_p8), %s182_s23, 4294965248  ;;  %v1399_v0 = vmov 0   ;;  %v420_v1 = vld [vmem:[%s1948_s1 + $0x10] sm:$0xff]  ;;  %v418_v2 = vld [vmem:[%s1948_s1] sm:$0xff]  ;;  %v1400_v21 = vmov 32.0   ;;  %vm626_vm13 = vcmask 261120  }
  0x23   : > { %1271 = vset.pattern.permute.xlu1 %v1399_v0  ;;  %1270 = vset.pattern.permute.xlu0 %v1399_v0  ;;  %v458_v3 = vld [vmem:[%s1949_s2] sm:$0xff]  ;;  %v421_v4 = vld [vmem:[%s1948_s1 + $0x18] sm:$0xff]  ;;  %v419_v5 = vld [vmem:[%s1948_s1 + $0x8] sm:$0xff]  ;;  %1273 = vrcp.f32 %v1400_v21  ;;  %s1402_s30 = smov 96   ;;  %s1403_s4 = smov 64   ;;  %vm1043_vm14 = vcmask 785408  }
  0x24   : > { %1272 = vset.pattern.permute.xlu2 %v1399_v0  ;;  %434 = vperm.xlu1 %1271, %v420_v1   ;;  %v459_v6 = vld [vmem:[%s1949_s2 + $0x8] sm:$0xff]  ;;  %v461_v7 = vld [vmem:[%s1949_s2 + $0x18] sm:$0xff]  ;;  %v460_v8 = vld [vmem:[%s1949_s2 + $0x10] sm:$0xff]  ;;  %vm1026_vm15 = vcmask 523264   ;;  %s1822_s5 = scalar_lea.vmem [#allocation6], %s1189_s21  ;;  %s1197_s21 = sshll.u32 %s1387_s15, 7 }
  0x25   : > { %424 = vperm.xlu0 %1270, %v418_v2   ;;  %464 = vperm.xlu2 %1272, %v458_v3   ;;  %v1537_v9 = vld [vmem:[%s1506_s22] sm:$0xff]  ;;  %v1540_v10 = vld [vmem:[%s1506_s22 + $0x8] sm:$0xff]  ;;  %v1543_v11 = vld [vmem:[%s1506_s22 + $0x10] sm:$0xff]  ;;  %s1090_s7 = scalar_lea.hbm %s1950_s3, %s1197_s21  ;;  %s1091_s8 = sshll.u32 %s1822_s5, 4  ;;  %s1092_s8 = int_to_ptr.vmem [resolvable:$true] %s1091_s8 }
  0x26   : > { %v1546_v12 = vld [vmem:[%s1506_s22 + $0x18] sm:$0xff]  ;;  %v1549_v13 = vld [vmem:[%s1506_s22 + $0x20] sm:$0xff]  ;;  %v1552_v14 = vld [vmem:[%s1506_s22 + $0x28] sm:$0xff]  ;;  %v274_v20 = vmul.f32 %v1537_v9, %v1537_v9  ;;  %v275_v27 = vmul.f32 %v1540_v10, %v1540_v10  ;;  %v276_v33 = vmul.f32 %v1543_v11, %v1543_v11  ;;  %s1093_s9 = sshll.u32 %s1090_s7, 4  ;;  %s1077_s15 = scalar_lea.sflag [#allocation5], %s1500_s19  ;;  %s1094_s9 = int_to_ptr.hbm [resolvable:$true] %s1093_s9 }
  0x27   : > { %v1555_v15 = vld [vmem:[%s1506_s22 + $0x30] sm:$0xff]  ;;  %v1558_v16 = vld [vmem:[%s1506_s22 + $0x38] sm:$0xff]  ;;  %v1561_v17 = vld [vmem:[%s1506_s22 + $0x40] sm:$0xff]  ;;  %v227_v18 = vadd.f32 %v1549_v13, %v1537_v9  ;;  %v236_v19 = vadd.f32 %v1552_v14, %v1540_v10  ;;  %v1599_v34 = vmul.f32 %v1546_v12, %v1546_v12  ;;  %v278_v38 = vmul.f32 %v1549_v13, %v1549_v13  ;;  %s1327_s10 = sshra.s32 %s1094_s9, 4  ;;  %s1333_s28 = scalar_lea.hbm %s1950_s3, 256  ;;  %s1328_s10 = int_to_ptr.hbm [resolvable:$true] %s1327_s10 }
  0x28   : > { %v1570_v22 = vld [vmem:[%s1506_s22 + $0x48] sm:$0xff]  ;;  %v1573_v23 = vld [vmem:[%s1506_s22 + $0x50] sm:$0xff]  ;;  %v1576_v24 = vld [vmem:[%s1506_s22 + $0x58] sm:$0xff]  ;;  %v245_v25 = vadd.f32 %v1555_v15, %v1543_v11  ;;  %v254_v26 = vadd.f32 %v1558_v16, %v1546_v12  ;;  %v279_v39 = vmul.f32 %v1552_v14, %v1552_v14  ;;  %v280_v42 = vmul.f32 %v1555_v15, %v1555_v15  ;;  %s1329_s11 = scalar_lea.hbm %s1328_s10, 128  ;;  %p1334_p7 = scmp.lt.s32.totalorder %s1328_s10, %s1950_s3 }
  0x29   : > { %v1585_v28 = vld [vmem:[%s1506_s22 + $0x60] sm:$0xff]  ;;  %v1588_v29 = vld [vmem:[%s1506_s22 + $0x68] sm:$0xff]  ;;  %v1591_v30 = vld [vmem:[%s1506_s22 + $0x70] sm:$0xff]  ;;  %v228_v31 = vadd.f32 %v227_v18, %v1561_v17  ;;  %v237_v32 = vadd.f32 %v236_v19, %v1570_v22  ;;  %v282_v43 = vmul.f32 %v1561_v17, %v1561_v17  ;;  %v283_v46 = vmul.f32 %v1570_v22, %v1570_v22  ;;  %v1274_v52 = vpop.eup %1273  ;;  %p1330_p4 = scmp.ne.s32.totalorder %s1328_s10, %s1329_s11  ;;  %p1335_p8 = scmp.lt.s32.totalorder %s1333_s28, %s1329_s11 }
  0x2a   : > { %v1602_v35 = vld [vmem:[%s1506_s22 + $0x78] sm:$0xff]  ;;  %v246_v36 = vadd.f32 %v245_v25, %v1573_v23  ;;  %v255_v37 = vadd.f32 %v254_v26, %v1576_v24  ;;  %v284_v47 = vmul.f32 %v1573_v23, %v1573_v23  ;;  %v286_v50 = vmul.f32 %v1585_v28, %v1585_v28  ;;  %s1401_s22 = smov 32  }
  0x2b   : > { %v229_v40 = vadd.f32 %v228_v31, %v1585_v28  ;;  %v238_v41 = vadd.f32 %v237_v32, %v1588_v29  ;;  %v287_v51 = vmul.f32 %v1588_v29, %v1588_v29  ;;  %v288_v55 = vmul.f32 %v1591_v30, %v1591_v30  ;;  %p1331_p5 = pnand %p1330_p4, %p1477_p9  ;;  %p1336_p10 = por %p1335_p8, %p1334_p7 }
  0x2c   : > { %439 = vperm.xlu1 %1271, %v421_v4   ;;  %v247_v44 = vadd.f32 %v246_v36, %v1591_v30  ;;  %v256_v45 = vadd.f32 %v255_v37, %v1602_v35  ;;  %v290_v56 = vadd.f32 %v278_v38, %v274_v20  ;;  %v264_v57 = vmul.f32 32.0, %v1274_v52 }
  0x2d   : > { %429 = vperm.xlu0 %1270, %v419_v5   ;;  %469 = vperm.xlu2 %1272, %v459_v6   ;;  %v230_v48 = vrot.slane %v229_v40, 4  ;;  %v239_v49 = vrot.slane %v238_v41, 4  ;;  %v299_v60 = vadd.f32 %v279_v39, %v275_v27  ;;  %v308_v0 = vadd.f32 %v280_v42, %v276_v33  ;;  %p1332_p6 = pneg %p1331_p5 }
  0x2e   : > { %v248_v53 = vrot.slane %v247_v44, 4  ;;  %v257_v54 = vrot.slane %v256_v45, 4  ;;  %v291_v63 = vadd.f32 %v290_v56, %v282_v43  ;;  %v265_v1 = vsub.f32 1.0, %v264_v57 }
  0x2f   : > { %v231_v58 = vadd.f32 %v230_v48, %v229_v40  ;;  %v240_v59 = vadd.f32 %v239_v49, %v238_v41  ;;  %v300_v4 = vadd.f32 %v299_v60, %v283_v46  ;;  %v281_v6 = vmul.f32 %v1558_v16, %v1558_v16  ;;  %p1337_p13 = pnand %p1336_p10, %p1332_p6 }
  0x30   : > { %v249_v61 = vadd.f32 %v248_v53, %v247_v44  ;;  %v258_v62 = vadd.f32 %v257_v54, %v256_v45  ;;  %v266_v18 = vmul.f32 %v1274_v52, %v265_v1  ;;  %vm268_vm0 = vweird.f32 %v1274_v52 }
  0x31   : > { %v232_v2 = vrot.slane %v231_v58, 2  ;;  %v241_v3 = vrot.slane %v240_v59, 2  ;;  %v301_v21 = vadd.f32 %v300_v4, %v287_v51  ;;  %v285_v40 = vmul.f32 %v1576_v24, %v1576_v24 }
  0x32   : > { %v250_v5 = vrot.slane %v249_v61, 2  ;;  %v259_v26 = vrot.slane %v258_v62, 2  ;;  %v267_v32 = vadd.f32 %v1274_v52, %v266_v18  ;;  %v289_v41 = vmul.f32 %v1602_v35, %v1602_v35 }
  0x33   : > { %v233_v19 = vadd.f32 %v232_v2, %v231_v58  ;;  %v242_v20 = vadd.f32 %v241_v3, %v240_v59  ;;  %v302_v37 = vrot.slane %v301_v21, 4 }
  0x34   : > { %479 = vperm.xlu1 %1271, %v461_v7   ;;  %v292_v7 = vadd.f32 %v291_v63, %v286_v50  ;;  %v251_v25 = vadd.f32 %v250_v5, %v249_v61  ;;  %v260_v44 = vadd.f32 %v259_v26, %v258_v62  ;;  %v317_v50 = vadd.f32 %v281_v6, %v1599_v34 }
  0x35   : > { %474 = vperm.xlu0 %1270, %v460_v8   ;;  %v309_v8 = vadd.f32 %v308_v0, %v284_v47  ;;  %v234_v33 = vrot.slane %v233_v19, 1  ;;  %v243_v36 = vrot.slane %v242_v20, 1  ;;  %v303_v42 = vadd.f32 %v302_v37, %v301_v21 }
  0x36   : > { %v293_v27 = vrot.slane %v292_v7, 4  ;;  %v252_v38 = vrot.slane %v251_v25, 1  ;;  %v269_v47 = vsel %vm268_vm0, %v1274_v52, %v267_v32  ;;  %v318_v56 = vadd.f32 %v317_v50, %v285_v40 }
  0x37   : > { %v310_v31 = vadd.f32 %v309_v8, %v288_v55  ;;  %v235_v43 = vadd.f32 %v234_v33, %v233_v19  ;;  %v244_v48 = vadd.f32 %v243_v36, %v242_v20  ;;  %v304_v49 = vrot.slane %v303_v42, 2 }
  0x38   : > { %v294_v39 = vadd.f32 %v293_v27, %v292_v7  ;;  %v253_v51 = vadd.f32 %v252_v38, %v251_v25  ;;  %v261_v60 = vrot.slane %v260_v44, 1  ;;  %v319_v63 = vadd.f32 %v318_v56, %v289_v41 }
  0x39   : > { %v311_v46 = vrot.slane %v310_v31, 4  ;;  %v305_v55 = vadd.f32 %v304_v49, %v303_v42  ;;  %v1635_v57 = vmul.f32 %v269_v47, %v235_v43  ;;  %v1637_v61 = vmul.f32 %v269_v47, %v244_v48 }
  0x3a   : > { %v295_v45 = vrot.slane %v294_v39, 2  ;;  %v1639_v0 = vmul.f32 %v269_v47, %v253_v51  ;;  %v320_v34 = vrot.slane %v319_v63, 4  ;;  %v262_v6 = vadd.f32 %v261_v60, %v260_v44 }
  0x3b   : > { %v312_v54 = vadd.f32 %v311_v46, %v310_v31  ;;  %v306_v62 = vrot.slane %v305_v55, 1  ;;  %v330_v5 = vmul.f32 %v1635_v57, %v1635_v57  ;;  %v331_v18 = vmul.f32 %v1637_v61, %v1637_v61 }
  0x3c   : > { %v296_v53 = vadd.f32 %v295_v45, %v294_v39  ;;  %v321_v7 = vadd.f32 %v320_v34, %v319_v63  ;;  %v332_v20 = vmul.f32 %v1639_v0, %v1639_v0  ;;  %v1647_v27 = vmul.f32 %v269_v47, %v262_v6 }
  0x3d   : > { %v313_v59 = vrot.slane %v312_v54, 2  ;;  %v307_v2 = vadd.f32 %v306_v62, %v305_v55 }
  0x3e   : > { %v297_v58 = vrot.slane %v296_v53, 1  ;;  %v322_v21 = vrot.slane %v321_v7, 2  ;;  %v333_v39 = vmul.f32 %v1647_v27, %v1647_v27  ;;  %v401_v62 = vsub.f32 %v1602_v35, %v1647_v27 }
  0x3f   : > { %v314_v1 = vadd.f32 %v313_v59, %v312_v54  ;;  %v327_v8 = vmul.f32 %v307_v2, %v269_v47 }
  0x40   : > { %v298_v52 = vadd.f32 %v297_v58, %v296_v53  ;;  %v323_v31 = vadd.f32 %v322_v21, %v321_v7 }
  0x41   : > { %v315_v3 = vrot.slane %v314_v1, 1  ;;  %v335_v32 = vsub.f32 %v327_v8, %v331_v18 }
  0x42   : > { %v326_v4 = vmul.f32 %v298_v52, %v269_v47  ;;  %v324_v36 = vrot.slane %v323_v31, 1 }
  0x43   : > { %v316_v19 = vadd.f32 %v315_v3, %v314_v1  ;;  %v339_v40 = vmax.f32 %v335_v32, 0.0  ;;  %v388_v32 = vsub.f32 %v1543_v11, %v1639_v0 }
  0x44   : > { %v334_v26 = vsub.f32 %v326_v4, %v330_v5  ;;  %v325_v38 = vadd.f32 %v324_v36, %v323_v31  ;;  %v387_v31 = vsub.f32 %v1540_v10, %v1637_v61  ;;  %v390_v10 = vsub.f32 %v1549_v13, %v1635_v57 }
  0x45   : > { %v328_v25 = vmul.f32 %v316_v19, %v269_v47  ;;  %v343_v45 = vadd.f32 1e-05, %v339_v40 }
  0x46   : > { %v338_v37 = vmax.f32 %v334_v26, 0.0  ;;  %v329_v42 = vmul.f32 %v325_v38, %v269_v47  ;;  %v386_v26 = vsub.f32 %v1537_v9, %v1635_v57 }
  0x47   : > { %v336_v33 = vsub.f32 %v328_v25, %v332_v20  ;;  %vm362_vm6 = vweird.f32 %v343_v45  ;;  %v397_v25 = vsub.f32 %v1576_v24, %v1647_v27 }
  0x48   : > { %v342_v43 = vadd.f32 1e-05, %v338_v37  ;;  %v337_v44 = vsub.f32 %v329_v42, %v333_v39 }
  0x49   : > { %v340_v41 = vmax.f32 %v336_v33, 0.0  ;;  %v389_v33 = vsub.f32 %v1546_v12, %v1647_v27  ;;  %v391_v12 = vsub.f32 %v1552_v14, %v1637_v61 }
  0x4a   : > { %v341_v48 = vmax.f32 %v337_v44, 0.0  ;;  %1275 = vrsqrt.f32 %v342_v43  ;;  %vm352_vm4 = vweird.f32 %v342_v43 }
  0x4b   : > { %v344_v46 = vadd.f32 1e-05, %v340_v41  ;;  %1277 = vrsqrt.f32 %v343_v45 }
  0x4c   : > { %v345_v49 = vadd.f32 1e-05, %v341_v48 }
  0x4d   : > { %1279 = vrsqrt.f32 %v344_v46  ;;  %vm372_vm8 = vweird.f32 %v344_v46 }
  0x4e   : > { %1281 = vrsqrt.f32 %v345_v49  ;;  %vm382_vm1 = vweird.f32 %v345_v49 }
  0x50   : > { %v1276_v50 = vpop.eup %1275 }
  0x51   : > { %v1278_v51 = vpop.eup %1277  ;;  %v347_v56 = vmul.f32 %v1276_v50, %v342_v43  ;;  %vm353_vm5 = vweird.f32 %v1276_v50 }
  0x52   : > { %v357_v58 = vmul.f32 %v1278_v51, %v343_v45  ;;  %vm363_vm7 = vweird.f32 %v1278_v51  ;;  %vm354_vm10 = vmor %vm352_vm4, %vm353_vm5  ;;  %v392_v45 = vsub.f32 %v1555_v15, %v1639_v0 }
  0x53   : > { %v1280_v53 = vpop.eup %1279  ;;  %v348_v63 = vmul.f32 %v1276_v50, %v347_v56  ;;  %vm364_vm11 = vmor %vm362_vm6, %vm363_vm7 }
  0x54   : > { %v1282_v54 = vpop.eup %1281  ;;  %v367_v59 = vmul.f32 %v1280_v53, %v344_v46  ;;  %v358_v52 = vmul.f32 %v1278_v51, %v357_v58  ;;  %vm373_vm9 = vweird.f32 %v1280_v53  ;;  %v393_v46 = vsub.f32 %v1558_v16, %v1647_v27 }
  0x55   : > { %v377_v55 = vmul.f32 %v1282_v54, %v345_v49  ;;  %vm383_vm2 = vweird.f32 %v1282_v54  ;;  %v349_v3 = vmul.f32 0.5, %v348_v63  ;;  %vm374_vm12 = vmor %vm372_vm8, %vm373_vm9  ;;  %v395_v16 = vsub.f32 %v1570_v22, %v1637_v61 }
  0x56   : > { %v368_v1 = vmul.f32 %v1280_v53, %v367_v59  ;;  %vm384_vm3 = vmor %vm382_vm1, %vm383_vm2  ;;  %v359_v4 = vmul.f32 0.5, %v358_v52  ;;  %v396_v27 = vsub.f32 %v1573_v23, %v1639_v0 }
  0x57   : > { %v378_v60 = vmul.f32 %v1282_v54, %v377_v55  ;;  %v350_v8 = vsub.f32 1.5, %v349_v3 }
  0x58   : > { %v369_v5 = vmul.f32 0.5, %v368_v1  ;;  %v360_v18 = vsub.f32 1.5, %v359_v4 }
  0x59   : > { %v379_v47 = vmul.f32 0.5, %v378_v60  ;;  %v351_v35 = vmul.f32 %v1276_v50, %v350_v8 }
  0x5a   : > { %v370_v19 = vsub.f32 1.5, %v369_v5  ;;  %v361_v20 = vmul.f32 %v1278_v51, %v360_v18 }
  0x5b   : > { %v380_v2 = vsub.f32 1.5, %v379_v47  ;;  %v1663_v36 = vsel %vm354_vm10, %v1276_v50, %v351_v35 }
  0x5c   : > { %v371_v21 = vmul.f32 %v1280_v53, %v370_v19  ;;  %v365_v37 = vsel %vm364_vm11, %v1278_v51, %v361_v20  ;;  %v402_v40 = vmul.f32 %v386_v26, %v1663_v36  ;;  %v406_v56 = vmul.f32 %v390_v10, %v1663_v36 }
  0x5d   : > { %v381_v34 = vmul.f32 %v1282_v54, %v380_v2  ;;  %v403_v24 = vmul.f32 %v387_v31, %v365_v37  ;;  %v407_v58 = vmul.f32 %v391_v12, %v365_v37  ;;  %v394_v2 = vsub.f32 %v1561_v17, %v1635_v57 }
  0x5e   : > { %v375_v38 = vsel %vm374_vm12, %v1280_v53, %v371_v21  ;;  %v399_v19 = vsub.f32 %v1588_v29, %v1637_v61  ;;  %v400_v17 = vsub.f32 %v1591_v30, %v1639_v0  ;;  %v398_v20 = vsub.f32 %v1585_v28, %v1635_v57 }
  0x5f   : > { %v385_v6 = vsel %vm384_vm3, %v1282_v54, %v381_v34  ;;  %v404_v41 = vmul.f32 %v388_v32, %v375_v38  ;;  %v408_v14 = vmul.f32 %v392_v45, %v375_v38  ;;  %v412_v8 = vmul.f32 %v396_v27, %v375_v38 }
  0x60   : > { %v417_v7 = vmul.f32 %v401_v62, %v385_v6  ;;  %v413_v39 = vmul.f32 %v397_v25, %v385_v6  ;;  %v405_v42 = vmul.f32 %v389_v33, %v385_v6  ;;  %v409_v59 = vmul.f32 %v393_v46, %v385_v6 }
  0x61   : > { %v411_v6 = vmul.f32 %v395_v16, %v365_v37  ;;  %v410_v22 = vmul.f32 %v394_v2, %v1663_v36  ;;  %v415_v31 = vmul.f32 %v399_v19, %v365_v37  ;;  %v416_v32 = vmul.f32 %v400_v17, %v375_v38 }
  0x62   : > { %v414_v33 = vmul.f32 %v398_v20, %v1663_v36 }
  0x7f   : > { %v465_v44 = vpop.permute.xlu2 %464 }
  0x87   : > { %v470_v34 = vpop.permute.xlu2 %469 }
  0x96   : > { %v435_v9 = vpop.permute.xlu1 %434 }
  0x97   : > { %v425_v43 = vpop.permute.xlu0 %424  ;;  %v1668_v11 = vmul.f32 %v435_v9, %v413_v39  ;;  %v452_v18 = vmul.f32 %v435_v9, %v412_v8  ;;  %v450_v35 = vmul.f32 %v435_v9, %v410_v22 }
  0x98   : > { %v442_v48 = vmul.f32 %v425_v43, %v402_v40  ;;  %v443_v49 = vmul.f32 %v425_v43, %v403_v24  ;;  %v444_v50 = vmul.f32 %v425_v43, %v404_v41  ;;  %v445_v51 = vmul.f32 %v425_v43, %v405_v42 }
  0x9a   : > { %v484_v53 = vadd.f32 %v465_v44, %v444_v50  ;;  %v483_v54 = vadd.f32 %v465_v44, %v443_v49  ;;  %v482_v55 = vadd.f32 %v465_v44, %v442_v48  ;;  %v485_v13 = vadd.f32 %v465_v44, %v445_v51 }
  0x9c   : > { %562 = vxpose.xlu1.b32.start [1/4] (short) %v484_v53, 128  ;;  %530 = vxpose.xlu0.b32.start [1/4] (short) %v483_v54, 128 }
  0x9d   : > { %498 = vxpose.xlu2.b32.start [1/4] (short) %v482_v55, 128 }
  0x9e   : > { %v440_v15 = vpop.permute.xlu1 %439 }
  0x9f   : > { %v430_v60 = vpop.permute.xlu0 %429  ;;  %v457_v47 = vmul.f32 %v440_v15, %v417_v7  ;;  %v451_v7 = vmul.f32 %v435_v9, %v411_v6  ;;  %v455_v40 = vmul.f32 %v440_v15, %v415_v31  ;;  %v456_v29 = vmul.f32 %v440_v15, %v416_v32 }
  0xa0   : > { %v446_v62 = vmul.f32 %v430_v60, %v406_v56  ;;  %v447_v63 = vmul.f32 %v430_v60, %v407_v58  ;;  %v448_v52 = vmul.f32 %v430_v60, %v408_v14  ;;  %v449_v1 = vmul.f32 %v430_v60, %v409_v59 }
  0xa1   : > { %v454_v61 = vmul.f32 %v440_v15, %v414_v33 }
  0xa2   : > { %v488_v3 = vadd.f32 %v470_v34, %v448_v52  ;;  %v487_v4 = vadd.f32 %v470_v34, %v447_v63  ;;  %v486_v5 = vadd.f32 %v470_v34, %v446_v62  ;;  %v489_v28 = vadd.f32 %v470_v34, %v449_v1 }
  0xa4   : > { %563 = vxpose.xlu1.b32.cont [2/4] (short) %v488_v3, 128  ;;  %531 = vxpose.xlu0.b32.cont [2/4] (short) %v487_v4, 128 }
  0xa5   : > { %499 = vxpose.xlu2.b32.cont [2/4] (short) %v486_v5, 128 }
  0xa6   : > { %v480_v39 = vpop.permute.xlu1 %479 }
  0xa7   : > { %v475_v23 = vpop.permute.xlu0 %474  ;;  %v495_v24 = vadd.f32 %v480_v39, %v455_v40  ;;  %v496_v30 = vadd.f32 %v480_v39, %v456_v29  ;;  %v494_v0 = vadd.f32 %v480_v39, %v454_v61  ;;  %v497_v37 = vadd.f32 %v480_v39, %v457_v47 }
  0xa8   : > { %v491_v21 = vadd.f32 %v475_v23, %v451_v7  ;;  %v492_v25 = vadd.f32 %v475_v23, %v452_v18  ;;  %v490_v26 = vadd.f32 %v475_v23, %v450_v35  ;;  %v493_v57 = vadd.f32 %v475_v23, %v1668_v11 }
  0xac   : > { %564 = vxpose.xlu1.b32.cont [3/4] (short) %v492_v25, 128  ;;  %532 = vxpose.xlu0.b32.cont [3/4] (short) %v491_v21, 128 }
  0xad   : > { %500 = vxpose.xlu2.b32.cont [3/4] (short) %v490_v26, 128 }
  0xb4   : > { %565 = vxpose.xlu1.b32.end [4/4] (short) %v496_v30, 128  ;;  %533 = vxpose.xlu0.b32.end [4/4] (short) %v495_v24, 128 }
  0xb5   : > { %501 = vxpose.xlu2.b32.end [4/4] (short) %v494_v0, 128 }
 0x11d   : > { %594 = vxpose.xlu2.b32.start [1/4] (short) %v485_v13, 128 }
 0x125   : > { %595 = vxpose.xlu2.b32.cont [2/4] (short) %v489_v28, 128 }
 0x12d   : > { %596 = vxpose.xlu2.b32.cont [3/4] (short) %v493_v57, 128 }
 0x135   : > { %597 = vxpose.xlu2.b32.end [4/4] (short) %v497_v37, 128 }
 0x136   : > { %v514_v36 = vpop.trf.xlu2 }
 0x137   : > { %627 = vst.msk [vmem:[#allocation2] sm:$0xff] %vm626_vm13, %v514_v36 }
 0x13e   : > { %v515_v38 = vpop.trf.xlu2 }
 0x13f   : > { %628 = vst.msk [vmem:[#allocation2 + $0x8] sm:$0xff] %vm626_vm13, %v515_v38 }
 0x140   : > { %v546_v41 = vpop.trf.xlu0  ;;  %v578_v42 = vpop.trf.xlu1 }
 0x141   : > { %643 = vst.msk [vmem:[#allocation2 + $0x80] sm:$0xff] %vm626_vm13, %v546_v41 }
 0x142   : > { %659 = vst.msk [vmem:[#allocation2 + $0x100] sm:$0xff] %vm626_vm13, %v578_v42 }
 0x146   : > { %v516_v9 = vpop.trf.xlu2 }
 0x147   : > { %629 = vst.msk [vmem:[#allocation2 + $0x10] sm:$0xff] %vm626_vm13, %v516_v9 }
 0x148   : > { %v547_v43 = vpop.trf.xlu0  ;;  %v579_v10 = vpop.trf.xlu1 }
 0x149   : > { %644 = vst.msk [vmem:[#allocation2 + $0x88] sm:$0xff] %vm626_vm13, %v547_v43 }
 0x14a   : > { %660 = vst.msk [vmem:[#allocation2 + $0x108] sm:$0xff] %vm626_vm13, %v579_v10 }
 0x14e   : > { %v517_v44 = vpop.trf.xlu2 }
 0x14f   : > { %630 = vst.msk [vmem:[#allocation2 + $0x18] sm:$0xff] %vm626_vm13, %v517_v44 }
 0x150   : > { %v548_v11 = vpop.trf.xlu0  ;;  %v580_v12 = vpop.trf.xlu1 }
 0x151   : > { %645 = vst.msk [vmem:[#allocation2 + $0x90] sm:$0xff] %vm626_vm13, %v548_v11 }
 0x152   : > { %661 = vst.msk [vmem:[#allocation2 + $0x110] sm:$0xff] %vm626_vm13, %v580_v12 }
 0x156   : > { %v518_v45 = vpop.trf.xlu2  ;;  %v723_v63 = vld [vmem:[#allocation2 + $0x1] ss:$4 sm:$0xff] }
 0x157   : > { %631 = vst.msk [vmem:[#allocation2 + $0x20] sm:$0xff] %vm626_vm13, %v518_v45 }
 0x158   : > { %v549_v46 = vpop.trf.xlu0  ;;  %v581_v48 = vpop.trf.xlu1 }
 0x159   : > { %646 = vst.msk [vmem:[#allocation2 + $0x98] sm:$0xff] %vm626_vm13, %v549_v46 }
 0x15a   : > { %662 = vst.msk [vmem:[#allocation2 + $0x118] sm:$0xff] %vm626_vm13, %v581_v48 }
 0x15e   : > { %v519_v49 = vpop.trf.xlu2 }
 0x15f   : > { %632 = vst.msk [vmem:[#allocation2 + $0x28] sm:$0xff] %vm626_vm13, %v519_v49 }
 0x160   : > { %v550_v50 = vpop.trf.xlu0  ;;  %v582_v51 = vpop.trf.xlu1  ;;  %v731_v2 = vld [vmem:[#allocation2 + $0x81] ss:$4 sm:$0xff] }
 0x161   : > { %647 = vst.msk [vmem:[#allocation2 + $0xa0] sm:$0xff] %vm626_vm13, %v550_v50  ;;  %v739_v20 = vld [vmem:[#allocation2 + $0x101] ss:$4 sm:$0xff]  ;;  %v803_v48 = vld [vmem:[#allocation2 + $0x103] ss:$4 sm:$0xff] }
 0x162   : > { %663 = vst.msk [vmem:[#allocation2 + $0x120] sm:$0xff] %vm626_vm13, %v582_v51 }
 0x166   : > { %v520_v53 = vpop.trf.xlu2 }
 0x167   : > { %633 = vst.msk [vmem:[#allocation2 + $0x30] sm:$0xff] %vm626_vm13, %v520_v53 }
 0x168   : > { %v551_v54 = vpop.trf.xlu0  ;;  %v583_v55 = vpop.trf.xlu1 }
 0x169   : > { %648 = vst.msk [vmem:[#allocation2 + $0xa8] sm:$0xff] %vm626_vm13, %v551_v54  ;;  %v755_v54 = vld [vmem:[#allocation2 + $0x2] ss:$4 sm:$0xff] }
 0x16a   : > { %664 = vst.msk [vmem:[#allocation2 + $0x128] sm:$0xff] %vm626_vm13, %v583_v55 }
 0x16e   : > { %v521_v13 = vpop.trf.xlu2 }
 0x16f   : > { %634 = vst.msk [vmem:[#allocation2 + $0x38] sm:$0xff] %vm626_vm13, %v521_v13 }
 0x170   : > { %v552_v56 = vpop.trf.xlu0  ;;  %v584_v58 = vpop.trf.xlu1 }
 0x171   : > { %649 = vst.msk [vmem:[#allocation2 + $0xb0] sm:$0xff] %vm626_vm13, %v552_v56 }
 0x172   : > { %665 = vst.msk [vmem:[#allocation2 + $0x130] sm:$0xff] %vm626_vm13, %v584_v58 }
 0x176   : > { %v522_v14 = vpop.trf.xlu2  ;;  %v725_v59 = vld [vmem:[#allocation2 + $0x21] ss:$4 sm:$0xff] }
 0x177   : > { %635 = vst.msk [vmem:[#allocation2 + $0x40] sm:$0xff] %vm626_vm13, %v522_v14  ;;  %836 = vrot.lane.b32.xlu1 %v725_v59, %s1401_s22  ;;  %v763_v14 = vld [vmem:[#allocation2 + $0x82] ss:$4 sm:$0xff] }
 0x178   : > { %v553_v15 = vpop.trf.xlu0  ;;  %v585_v60 = vpop.trf.xlu1 }
 0x179   : > { %650 = vst.msk [vmem:[#allocation2 + $0xb8] sm:$0xff] %vm626_vm13, %v553_v15 }
 0x17a   : > { %666 = vst.msk [vmem:[#allocation2 + $0x138] sm:$0xff] %vm626_vm13, %v585_v60  ;;  %v771_v60 = vld [vmem:[#allocation2 + $0x102] ss:$4 sm:$0xff] }
 0x17e   : > { %v523_v16 = vpop.trf.xlu2 }
 0x17f   : > { %636 = vst.msk [vmem:[#allocation2 + $0x48] sm:$0xff] %vm626_vm13, %v523_v16  ;;  %v757_v16 = vld [vmem:[#allocation2 + $0x22] ss:$4 sm:$0xff] }
 0x180   : > { %v554_v27 = vpop.trf.xlu0  ;;  %v733_v47 = vld [vmem:[#allocation2 + $0xa1] ss:$4 sm:$0xff]  ;;  %v586_v62 = vpop.trf.xlu1  ;;  %v797_v45 = vld [vmem:[#allocation2 + $0xa3] ss:$4 sm:$0xff] }
 0x181   : > { %651 = vst.msk [vmem:[#allocation2 + $0xc0] sm:$0xff] %vm626_vm13, %v554_v27  ;;  %844 = vrot.lane.b32.xlu1 %v733_v47, %s1401_s22  ;;  %v741_v1 = vld [vmem:[#allocation2 + $0x121] ss:$4 sm:$0xff] }
 0x182   : > { %834 = vrot.lane.b32.xlu0 %v723_v63, %s1401_s22  ;;  %667 = vst.msk [vmem:[#allocation2 + $0x140] sm:$0xff] %vm626_vm13, %v586_v62  ;;  %v765_v63 = vld [vmem:[#allocation2 + $0xa2] ss:$4 sm:$0xff] }
 0x186   : > { %v524_v52 = vpop.trf.xlu2 }
 0x187   : > { %637 = vst.msk [vmem:[#allocation2 + $0x50] sm:$0xff] %vm626_vm13, %v524_v52 }
 0x188   : > { %v555_v34 = vpop.trf.xlu0  ;;  %v587_v3 = vpop.trf.xlu1 }
 0x189   : > { %652 = vst.msk [vmem:[#allocation2 + $0xc8] sm:$0xff] %vm626_vm13, %v555_v34  ;;  %852 = vrot.lane.b32.xlu1 %v741_v1, %s1401_s22 }
 0x18a   : > { %842 = vrot.lane.b32.xlu0 %v731_v2, %s1401_s22  ;;  %668 = vst.msk [vmem:[#allocation2 + $0x148] sm:$0xff] %vm626_vm13, %v587_v3  ;;  %v787_v3 = vld [vmem:[#allocation2 + $0x3] ss:$4 sm:$0xff] }
 0x18e   : > { %v525_v4 = vpop.trf.xlu2 }
 0x18f   : > { %638 = vst.msk [vmem:[#allocation2 + $0x58] sm:$0xff] %vm626_vm13, %v525_v4  ;;  %v773_v4 = vld [vmem:[#allocation2 + $0x122] ss:$4 sm:$0xff] }
 0x190   : > { %v556_v5 = vpop.trf.xlu0  ;;  %v588_v6 = vpop.trf.xlu1 }
 0x191   : > { %653 = vst.msk [vmem:[#allocation2 + $0xd0] sm:$0xff] %vm626_vm13, %v556_v5 }
 0x192   : > { %669 = vst.msk [vmem:[#allocation2 + $0x150] sm:$0xff] %vm626_vm13, %v588_v6 }
 0x196   : > { %v526_v8 = vpop.trf.xlu2  ;;  %v727_v10 = vld [vmem:[#allocation2 + $0x41] ss:$4 sm:$0xff]  ;;  %v791_v11 = vld [vmem:[#allocation2 + $0x43] ss:$4 sm:$0xff]  ;;  %v759_v56 = vld [vmem:[#allocation2 + $0x42] ss:$4 sm:$0xff] }
 0x197   : > { %639 = vst.msk [vmem:[#allocation2 + $0x60] sm:$0xff] %vm626_vm13, %v526_v8 }
 0x198   : > { %v557_v22 = vpop.trf.xlu0  ;;  %v589_v23 = vpop.trf.xlu1 }
 0x199   : > { %654 = vst.msk [vmem:[#allocation2 + $0xd8] sm:$0xff] %vm626_vm13, %v557_v22 }
 0x19a   : > { %670 = vst.msk [vmem:[#allocation2 + $0x158] sm:$0xff] %vm626_vm13, %v589_v23 }
 0x19e   : > { %v527_v7 = vpop.trf.xlu2 }
 0x19f   : > { %640 = vst.msk [vmem:[#allocation2 + $0x68] sm:$0xff] %vm626_vm13, %v527_v7 }
 0x1a0   : > { %v558_v18 = vpop.trf.xlu0  ;;  %v735_v19 = vld [vmem:[#allocation2 + $0xc1] ss:$4 sm:$0xff]  ;;  %v590_v17 = vpop.trf.xlu1  ;;  %v767_v59 = vld [vmem:[#allocation2 + $0xc2] ss:$4 sm:$0xff]  ;;  %v799_v23 = vld [vmem:[#allocation2 + $0xc3] ss:$4 sm:$0xff] }
 0x1a1   : > { %655 = vst.msk [vmem:[#allocation2 + $0xe0] sm:$0xff] %vm626_vm13, %v558_v18  ;;  %846 = vrot.lane.b32.xlu0 %v735_v19, %s1401_s22  ;;  %v743_v31 = vld [vmem:[#allocation2 + $0x141] ss:$4 sm:$0xff]  ;;  %v775_v27 = vld [vmem:[#allocation2 + $0x142] ss:$4 sm:$0xff] }
 0x1a2   : > { %671 = vst.msk [vmem:[#allocation2 + $0x160] sm:$0xff] %vm626_vm13, %v590_v17  ;;  %v805_v17 = vld [vmem:[#allocation2 + $0x123] ss:$4 sm:$0xff] }
 0x1a6   : > { %v528_v35 = vpop.trf.xlu2 }
 0x1a7   : > { %641 = vst.msk [vmem:[#allocation2 + $0x70] sm:$0xff] %vm626_vm13, %v528_v35 }
 0x1a8   : > { %v559_v21 = vpop.trf.xlu0  ;;  %v591_v25 = vpop.trf.xlu1 }
 0x1a9   : > { %656 = vst.msk [vmem:[#allocation2 + $0xe8] sm:$0xff] %vm626_vm13, %v559_v21  ;;  %850 = vrot.lane.b32.xlu0 %v739_v20, %s1401_s22 }
 0x1aa   : > { %672 = vst.msk [vmem:[#allocation2 + $0x168] sm:$0xff] %vm626_vm13, %v591_v25  ;;  %v789_v25 = vld [vmem:[#allocation2 + $0x23] ss:$4 sm:$0xff] }
 0x1ae   : > { %v529_v26 = vpop.trf.xlu2 }
 0x1af   : > { %642 = vst.msk [vmem:[#allocation2 + $0x78] sm:$0xff] %vm626_vm13, %v529_v26 }
 0x1b0   : > { %v560_v32 = vpop.trf.xlu0  ;;  %v592_v33 = vpop.trf.xlu1 }
 0x1b1   : > { %657 = vst.msk [vmem:[#allocation2 + $0xf0] sm:$0xff] %vm626_vm13, %v560_v32  ;;  %854 = vrot.lane.b32.xlu0 %v743_v31, %s1401_s22 }
 0x1b2   : > { %673 = vst.msk [vmem:[#allocation2 + $0x170] sm:$0xff] %vm626_vm13, %v592_v33  ;;  %v795_v33 = vld [vmem:[#allocation2 + $0x83] ss:$4 sm:$0xff] }
 0x1b6   : > { %v610_v39 = vpop.trf.xlu2  ;;  %v729_v40 = vld [vmem:[#allocation2 + $0x61] ss:$4 sm:$0xff]  ;;  %v761_v47 = vld [vmem:[#allocation2 + $0x62] ss:$4 sm:$0xff]  ;;  %v793_v6 = vld [vmem:[#allocation2 + $0x63] ss:$4 sm:$0xff] }
 0x1b7   : > { %675 = vst.msk [vmem:[#allocation2 + $0x180] sm:$0xff] %vm626_vm13, %v610_v39  ;;  %840 = vrot.lane.b32.xlu1 %v729_v40, %s1401_s22 }
 0x1b8   : > { %v561_v29 = vpop.trf.xlu0  ;;  %v593_v61 = vpop.trf.xlu1 }
 0x1b9   : > { %658 = vst.msk [vmem:[#allocation2 + $0xf8] sm:$0xff] %vm626_vm13, %v561_v29 }
 0x1ba   : > { %674 = vst.msk [vmem:[#allocation2 + $0x178] sm:$0xff] %vm626_vm13, %v593_v61 }
 0x1be   : > { %v611_v24 = vpop.trf.xlu2 }
 0x1bf   : > { %676 = vst.msk [vmem:[#allocation2 + $0x188] sm:$0xff] %vm626_vm13, %v611_v24 }
 0x1c0   : > { %v737_v30 = vld [vmem:[#allocation2 + $0xe1] ss:$4 sm:$0xff]  ;;  %v769_v2 = vld [vmem:[#allocation2 + $0xe2] ss:$4 sm:$0xff]  ;;  %v801_v29 = vld [vmem:[#allocation2 + $0xe3] ss:$4 sm:$0xff] }
 0x1c1   : > { %848 = vrot.lane.b32.xlu1 %v737_v30, %s1401_s22  ;;  %v745_v28 = vld [vmem:[#allocation2 + $0x161] ss:$4 sm:$0xff]  ;;  %v809_v51 = vld [vmem:[#allocation2 + $0x163] ss:$4 sm:$0xff]  ;;  %v777_v8 = vld [vmem:[#allocation2 + $0x162] ss:$4 sm:$0xff] }
 0x1c6   : > { %v612_v0 = vpop.trf.xlu2 }
 0x1c7   : > { %677 = vst.msk [vmem:[#allocation2 + $0x190] sm:$0xff] %vm626_vm13, %v612_v0  ;;  %v807_v0 = vld [vmem:[#allocation2 + $0x143] ss:$4 sm:$0xff] }
 0x1c9   : > { %856 = vrot.lane.b32.xlu1 %v745_v28, %s1401_s22  ;;  %v695_v28 = vld [vmem:[#allocation2 + $0x40] ss:$4 sm:$0xff] }
 0x1ce   : > { %v613_v57 = vpop.trf.xlu2 }
 0x1cf   : > { %678 = vst.msk [vmem:[#allocation2 + $0x198] sm:$0xff] %vm626_vm13, %v613_v57 }
 0x1d6   : > { %v614_v37 = vpop.trf.xlu2  ;;  %v747_v36 = vld [vmem:[#allocation2 + $0x181] ss:$4 sm:$0xff]  ;;  %v779_v62 = vld [vmem:[#allocation2 + $0x182] ss:$4 sm:$0xff]  ;;  %v811_v21 = vld [vmem:[#allocation2 + $0x183] ss:$4 sm:$0xff] }
 0x1d7   : > { %679 = vst.msk [vmem:[#allocation2 + $0x1a0] sm:$0xff] %vm626_vm13, %v614_v37  ;;  %858 = vrot.lane.b32.xlu0 %v747_v36, %s1401_s22 }
 0x1de   : > { %v615_v38 = vpop.trf.xlu2 }
 0x1df   : > { %680 = vst.msk [vmem:[#allocation2 + $0x1a8] sm:$0xff] %vm626_vm13, %v615_v38 }
 0x1e6   : > { %v616_v41 = vpop.trf.xlu2 }
 0x1e7   : > { %681 = vst.msk [vmem:[#allocation2 + $0x1b0] sm:$0xff] %vm626_vm13, %v616_v41 }
 0x1e9   : > { %v837_v22 = vpop.permute.xlu1 %836 }
 0x1ee   : > { %v617_v42 = vpop.trf.xlu2 }
 0x1ef   : > { %682 = vst.msk [vmem:[#allocation2 + $0x1b8] sm:$0xff] %vm626_vm13, %v617_v42 }
 0x1f3   : > { %v1799_v19 = vpop.permute.xlu1 %844 }
 0x1f4   : > { %v1787_v52 = vpop.permute.xlu0 %834 }
 0x1f6   : > { %v618_v9 = vpop.trf.xlu2  ;;  %v749_v43 = vld [vmem:[#allocation2 + $0x1a1] ss:$4 sm:$0xff]  ;;  %v781_v7 = vld [vmem:[#allocation2 + $0x1a2] ss:$4 sm:$0xff] }
 0x1f7   : > { %683 = vst.msk [vmem:[#allocation2 + $0x1c0] sm:$0xff] %vm626_vm13, %v618_v9  ;;  %860 = vrot.lane.b32.xlu1 %v749_v43, %s1401_s22  ;;  %v813_v9 = vld [vmem:[#allocation2 + $0x1a3] ss:$4 sm:$0xff]  ;;  %v699_v43 = vld [vmem:[#allocation2 + $0x80] ss:$4 sm:$0xff] }
 0x1fb   : > { %v1803_v26 = vpop.permute.xlu1 %852 }
 0x1fc   : > { %v843_v34 = vpop.permute.xlu0 %842 }
 0x1fe   : > { %838 = vrot.lane.b32.xlu2 %v727_v10, %s1401_s22  ;;  %v619_v44 = vpop.trf.xlu2  ;;  %v1014_v10 = vsel %vm626_vm13, %v699_v43, %v843_v34 }
 0x1ff   : > { %684 = vst.msk [vmem:[#allocation2 + $0x1c8] sm:$0xff] %vm626_vm13, %v619_v44 }
 0x206   : > { %966 = vrot.lane.b32.xlu2 %v791_v11, %s1402_s30  ;;  %v620_v12 = vpop.trf.xlu2 }
 0x207   : > { %685 = vst.msk [vmem:[#allocation2 + $0x1d0] sm:$0xff] %vm626_vm13, %v620_v12 }
 0x20e   : > { %972 = vrot.lane.b32.xlu2 %v797_v45, %s1402_s30  ;;  %v621_v46 = vpop.trf.xlu2 }
 0x20f   : > { %686 = vst.msk [vmem:[#allocation2 + $0x1d8] sm:$0xff] %vm626_vm13, %v621_v46 }
 0x213   : > { %v1793_v5 = vpop.permute.xlu0 %846 }
 0x216   : > { %978 = vrot.lane.b32.xlu2 %v803_v48, %s1402_s30  ;;  %v622_v49 = vpop.trf.xlu2  ;;  %v751_v50 = vld [vmem:[#allocation2 + $0x1c1] ss:$4 sm:$0xff]  ;;  %v815_v55 = vld [vmem:[#allocation2 + $0x1c3] ss:$4 sm:$0xff]  ;;  %v783_v1 = vld [vmem:[#allocation2 + $0x1c2] ss:$4 sm:$0xff] }
 0x217   : > { %687 = vst.msk [vmem:[#allocation2 + $0x1e0] sm:$0xff] %vm626_vm13, %v622_v49  ;;  %862 = vrot.lane.b32.xlu0 %v751_v50, %s1401_s22  ;;  %v693_v49 = vld [vmem:[#allocation2 + $0x20] ss:$4 sm:$0xff] }
 0x218   : > { %v707_v50 = vld [vmem:[#allocation2 + $0x100] ss:$4 sm:$0xff] }
 0x21b   : > { %v851_v18 = vpop.permute.xlu0 %850 }
 0x21e   : > { %984 = vrot.lane.b32.xlu2 %v809_v51, %s1402_s30  ;;  %v623_v53 = vpop.trf.xlu2  ;;  %v1011_v51 = vsel %vm626_vm13, %v693_v49, %v837_v22 }
 0x21f   : > { %688 = vst.msk [vmem:[#allocation2 + $0x1e8] sm:$0xff] %vm626_vm13, %v623_v53  ;;  %898 = vrot.lane.b32.xlu0 %v755_v54, %s1403_s4  ;;  %v1018_v53 = vsel %vm626_vm13, %v707_v50, %v851_v18 }
 0x223   : > { %v855_v20 = vpop.permute.xlu0 %854 }
 0x226   : > { %990 = vrot.lane.b32.xlu2 %v815_v55, %s1402_s30  ;;  %v624_v13 = vpop.trf.xlu2 }
 0x227   : > { %689 = vst.msk [vmem:[#allocation2 + $0x1f0] sm:$0xff] %vm626_vm13, %v624_v13  ;;  %902 = vrot.lane.b32.xlu0 %v759_v56, %s1403_s4 }
 0x229   : > { %v1809_v39 = vpop.permute.xlu1 %840 }
 0x22e   : > { %v625_v58 = vpop.trf.xlu2 }
 0x22f   : > { %690 = vst.msk [vmem:[#allocation2 + $0x1f8] sm:$0xff] %vm626_vm13, %v625_v58  ;;  %906 = vrot.lane.b32.xlu0 %v763_v14, %s1403_s4 }
 0x233   : > { %v1813_v61 = vpop.permute.xlu1 %848 }
 0x236   : > { %v753_v15 = vld [vmem:[#allocation2 + $0x1e1] ss:$4 sm:$0xff]  ;;  %v785_v35 = vld [vmem:[#allocation2 + $0x1e2] ss:$4 sm:$0xff]  ;;  %v817_v32 = vld [vmem:[#allocation2 + $0x1e3] ss:$4 sm:$0xff] }
 0x237   : > { %910 = vrot.lane.b32.xlu0 %v767_v59, %s1403_s4  ;;  %864 = vrot.lane.b32.xlu1 %v753_v15, %s1401_s22  ;;  %v711_v59 = vld [vmem:[#allocation2 + $0x140] ss:$4 sm:$0xff] }
 0x238   : > { %v1020_v15 = vsel %vm626_vm13, %v711_v59, %v855_v20 }
 0x23b   : > { %v857_v57 = vpop.permute.xlu1 %856 }
 0x23f   : > { %914 = vrot.lane.b32.xlu0 %v771_v60, %s1403_s4  ;;  %900 = vrot.lane.b32.xlu1 %v757_v16, %s1403_s4 }
 0x247   : > { %918 = vrot.lane.b32.xlu0 %v775_v27, %s1403_s4  ;;  %904 = vrot.lane.b32.xlu1 %v761_v47, %s1403_s4  ;;  %v701_v47 = vld [vmem:[#allocation2 + $0xa0] ss:$4 sm:$0xff] }
 0x249   : > { %v1807_v31 = vpop.permute.xlu0 %858 }
 0x24f   : > { %922 = vrot.lane.b32.xlu0 %v779_v62, %s1403_s4  ;;  %908 = vrot.lane.b32.xlu1 %v765_v63, %s1403_s4  ;;  %v1015_v63 = vsel %vm626_vm13, %v701_v47, %v1799_v19  ;;  %v691_v19 = vld [vmem:[#allocation2] ss:$4 sm:$0xff] }
 0x257   : > { %926 = vrot.lane.b32.xlu0 %v783_v1, %s1403_s4  ;;  %912 = vrot.lane.b32.xlu1 %v769_v2, %s1403_s4 }
 0x258   : > { %v839_v24 = vpop.permute.xlu2 %838 }
 0x259   : > { %v1012_v37 = vsel %vm626_vm13, %v695_v28, %v839_v24 }
 0x25f   : > { %962 = vrot.lane.b32.xlu0 %v787_v3, %s1402_s30  ;;  %916 = vrot.lane.b32.xlu1 %v773_v4, %s1403_s4  ;;  %v719_v4 = vld [vmem:[#allocation2 + $0x1c0] ss:$4 sm:$0xff] }
 0x260   : > { %v967_v38 = vpop.permute.xlu2 %966 }
 0x267   : > { %968 = vrot.lane.b32.xlu0 %v793_v6, %s1402_s30  ;;  %920 = vrot.lane.b32.xlu1 %v777_v8, %s1403_s4 }
 0x268   : > { %v973_v45 = vpop.permute.xlu2 %972 }
 0x269   : > { %v1827_v44 = vpop.permute.xlu1 %860 }
 0x26f   : > { %974 = vrot.lane.b32.xlu0 %v799_v23, %s1402_s30  ;;  %924 = vrot.lane.b32.xlu1 %v781_v7, %s1403_s4 }
 0x270   : > { %v979_v13 = vpop.permute.xlu2 %978 }
 0x277   : > { %980 = vrot.lane.b32.xlu0 %v805_v17, %s1402_s30  ;;  %928 = vrot.lane.b32.xlu1 %v785_v35, %s1403_s4  ;;  %v1010_v17 = vsel %vm626_vm13, %v691_v19, %v1787_v52 }
 0x278   : > { %v985_v62 = vpop.permute.xlu2 %984 }
 0x27f   : > { %986 = vrot.lane.b32.xlu0 %v811_v21, %s1402_s30  ;;  %964 = vrot.lane.b32.xlu1 %v789_v25, %s1402_s30 }
 0x280   : > { %v991_v23 = vpop.permute.xlu2 %990 }
 0x287   : > { %992 = vrot.lane.b32.xlu0 %v817_v32, %s1402_s30  ;;  %970 = vrot.lane.b32.xlu1 %v795_v33, %s1402_s30  ;;  %v697_v32 = vld [vmem:[#allocation2 + $0x60] ss:$4 sm:$0xff] }
 0x288   : > { %v1013_v33 = vsel %vm626_vm13, %v697_v32, %v1809_v39 }
 0x289   : > { %v863_v40 = vpop.permute.xlu0 %862 }
 0x28a   : > { %v1024_v6 = vsel %vm626_vm13, %v719_v4, %v863_v40  ;;  %v713_v40 = vld [vmem:[#allocation2 + $0x160] ss:$4 sm:$0xff] }
 0x28f   : > { %976 = vrot.lane.b32.xlu1 %v801_v29, %s1402_s30  ;;  %v1021_v29 = vsel %vm626_vm13, %v713_v40, %v857_v57 }
 0x291   : > { %v899_v30 = vpop.permute.xlu0 %898 }
 0x292   : > { %v1027_v35 = vsel %vm1026_vm15, %v1010_v17, %v899_v30 }
 0x297   : > { %982 = vrot.lane.b32.xlu1 %v807_v0, %s1402_s30 }
 0x299   : > { %v903_v36 = vpop.permute.xlu0 %902 }
 0x29a   : > { %v1029_v41 = vsel %vm1026_vm15, %v1012_v37, %v903_v36  ;;  %v703_v36 = vld [vmem:[#allocation2 + $0xc0] ss:$4 sm:$0xff] }
 0x29b   : > { %v1046_v42 = vsel %vm1043_vm14, %v1029_v41, %v967_v38  ;;  %v1016_v39 = vsel %vm626_vm13, %v703_v36, %v1793_v5  ;;  %v715_v5 = vld [vmem:[#allocation2 + $0x180] ss:$4 sm:$0xff] }
 0x29c   : > { %1062 = vst [vmem:[%s1822_s5 + $0x10] sm:$0xff] %v1046_v42 }
 0x29f   : > { %988 = vrot.lane.b32.xlu1 %v813_v9, %s1402_s30  ;;  %v709_v9 = vld [vmem:[#allocation2 + $0x120] ss:$4 sm:$0xff] }
 0x2a0   : > { %v1019_v43 = vsel %vm626_vm13, %v709_v9, %v1803_v26 }
 0x2a1   : > { %v907_v11 = vpop.permute.xlu0 %906 }
 0x2a2   : > { %v1830_v12 = vsel %vm1026_vm15, %v1014_v10, %v907_v11 }
 0x2a9   : > { %v911_v46 = vpop.permute.xlu0 %910  ;;  %v1832_v48 = vpop.permute.xlu1 %864 }
 0x2aa   : > { %v1033_v38 = vsel %vm1026_vm15, %v1016_v39, %v911_v46  ;;  %v1022_v46 = vsel %vm626_vm13, %v715_v5, %v1807_v31 }
 0x2b1   : > { %v915_v54 = vpop.permute.xlu0 %914  ;;  %v901_v55 = vpop.permute.xlu1 %900 }
 0x2b2   : > { %v1035_v56 = vsel %vm1026_vm15, %v1018_v53, %v915_v54  ;;  %v1838_v58 = vsel %vm1026_vm15, %v1011_v51, %v901_v55  ;;  %v721_v55 = vld [vmem:[#allocation2 + $0x1e0] ss:$4 sm:$0xff] }
 0x2b3   : > { %v1052_v14 = vsel %vm1043_vm14, %v1035_v56, %v979_v13  ;;  %v1025_v13 = vsel %vm626_vm13, %v721_v55, %v1832_v48 }
 0x2b4   : > { %1068 = vst [vmem:[%s1822_s5 + $0x40] sm:$0xff] %v1052_v14 }
 0x2b9   : > { %v919_v60 = vpop.permute.xlu0 %918  ;;  %v905_v16 = vpop.permute.xlu1 %904 }
 0x2ba   : > { %v1844_v27 = vsel %vm1026_vm15, %v1020_v15, %v919_v60  ;;  %v1030_v24 = vsel %vm1026_vm15, %v1013_v33, %v905_v16 }
 0x2c1   : > { %v923_v1 = vpop.permute.xlu0 %922  ;;  %v909_v2 = vpop.permute.xlu1 %908 }
 0x2c2   : > { %v1032_v34 = vsel %vm1026_vm15, %v1015_v63, %v909_v2  ;;  %v1039_v50 = vsel %vm1026_vm15, %v1022_v46, %v923_v1 }
 0x2c3   : > { %v1049_v3 = vsel %vm1043_vm14, %v1032_v34, %v973_v45 }
 0x2c4   : > { %1065 = vst [vmem:[%s1822_s5 + $0x28] sm:$0xff] %v1049_v3 }
 0x2c9   : > { %v927_v8 = vpop.permute.xlu0 %926  ;;  %v913_v22 = vpop.permute.xlu1 %912 }
 0x2ca   : > { %v1041_v7 = vsel %vm1026_vm15, %v1024_v6, %v927_v8 }
 0x2cb   : > { %v1058_v18 = vsel %vm1043_vm14, %v1041_v7, %v991_v23 }
 0x2cc   : > { %1074 = vst [vmem:[%s1822_s5 + $0x70] sm:$0xff] %v1058_v18 }
 0x2d1   : > { %v963_v20 = vpop.permute.xlu0 %962  ;;  %v917_v21 = vpop.permute.xlu1 %916 }
 0x2d2   : > { %v1044_v25 = vsel %vm1043_vm14, %v1027_v35, %v963_v20  ;;  %v1036_v10 = vsel %vm1026_vm15, %v1019_v43, %v917_v21 }
 0x2d3   : > { %1060 = vst [vmem:[%s1822_s5] sm:$0xff] %v1044_v25 }
 0x2d9   : > { %v969_v0 = vpop.permute.xlu0 %968  ;;  %v921_v52 = vpop.permute.xlu1 %920 }
 0x2da   : > { %v1047_v30 = vsel %vm1043_vm14, %v1030_v24, %v969_v0  ;;  %v1038_v28 = vsel %vm1026_vm15, %v1021_v29, %v921_v52 }
 0x2db   : > { %1063 = vst [vmem:[%s1822_s5 + $0x18] sm:$0xff] %v1047_v30  ;;  %v1055_v37 = vsel %vm1043_vm14, %v1038_v28, %v985_v62 }
 0x2dc   : > { %1071 = vst [vmem:[%s1822_s5 + $0x58] sm:$0xff] %v1055_v37 }
 0x2e1   : > { %v975_v57 = vpop.permute.xlu0 %974  ;;  %v925_v41 = vpop.permute.xlu1 %924 }
 0x2e2   : > { %v1050_v42 = vsel %vm1043_vm14, %v1033_v38, %v975_v57 }
 0x2e3   : > { %1066 = vst [vmem:[%s1822_s5 + $0x30] sm:$0xff] %v1050_v42 }
 0x2e9   : > { %v981_v11 = vpop.permute.xlu0 %980  ;;  %v929_v45 = vpop.permute.xlu1 %928 }
 0x2ea   : > { %v1053_v49 = vsel %vm1043_vm14, %v1036_v10, %v981_v11  ;;  %v1042_v31 = vsel %vm1026_vm15, %v1025_v13, %v929_v45 }
 0x2eb   : > { %1069 = vst [vmem:[%s1822_s5 + $0x48] sm:$0xff] %v1053_v49 }
 0x2f1   : > { %v987_v51 = vpop.permute.xlu0 %986  ;;  %v965_v53 = vpop.permute.xlu1 %964 }
 0x2f2   : > { %v1056_v54 = vsel %vm1043_vm14, %v1039_v50, %v987_v51  ;;  %v1045_v26 = vsel %vm1043_vm14, %v1838_v58, %v965_v53  ;;  %v705_v58 = vld [vmem:[#allocation2 + $0xe0] ss:$4 sm:$0xff] }
 0x2f3   : > { %1072 = vst [vmem:[%s1822_s5 + $0x60] sm:$0xff] %v1056_v54  ;;  %v1017_v60 = vsel %vm626_vm13, %v705_v58, %v1813_v61  ;;  %v717_v61 = vld [vmem:[#allocation2 + $0x1a0] ss:$4 sm:$0xff] }
 0x2f4   : > { %1061 = vst [vmem:[%s1822_s5 + $0x8] sm:$0xff] %v1045_v26  ;;  %v1034_v16 = vsel %vm1026_vm15, %v1017_v60, %v913_v22 }
 0x2f9   : > { %v993_v56 = vpop.permute.xlu0 %992  ;;  %v971_v14 = vpop.permute.xlu1 %970 }
 0x2fa   : > { %v1059_v59 = vsel %vm1043_vm14, %v1042_v31, %v993_v56  ;;  %v1048_v15 = vsel %vm1043_vm14, %v1830_v12, %v971_v14  ;;  %v1023_v12 = vsel %vm626_vm13, %v717_v61, %v1827_v44 }
 0x2fb   : > { %1075 = vst [vmem:[%s1822_s5 + $0x78] sm:$0xff] %v1059_v59  ;;  %v1040_v1 = vsel %vm1026_vm15, %v1023_v12, %v925_v41 }
 0x2fc   : > { %1064 = vst [vmem:[%s1822_s5 + $0x20] sm:$0xff] %v1048_v15 }
 0x301   : > { %v977_v48 = vpop.permute.xlu1 %976 }
 0x302   : > { %v1051_v47 = vsel %vm1043_vm14, %v1034_v16, %v977_v48 }
 0x303   : > { %1067 = vst [vmem:[%s1822_s5 + $0x38] sm:$0xff] %v1051_v47 }
 0x309   : > { %v983_v62 = vpop.permute.xlu1 %982 }
 0x30a   : > { %v1054_v63 = vsel %vm1043_vm14, %v1844_v27, %v983_v62 }
 0x30b   : > { %1070 = vst [vmem:[%s1822_s5 + $0x50] sm:$0xff] %v1054_v63 }
 0x311   : > { %v989_v2 = vpop.permute.xlu1 %988 }
 0x312   : > { %v1057_v34 = vsel %vm1043_vm14, %v1040_v1, %v989_v2 }
 0x313   : > { %1073 = vst [vmem:[%s1822_s5 + $0x68] sm:$0xff] %v1057_v34 }
 0x314   : > { %1340 = shalt.err (!%p1337_p13)
}
 0x315   : > { %s1404_s19 = smov 128   ;;  %s1405_s30 = smov 8  }
 0x316   : > { %1200 = dma.vmem_to_hbm [thread:$0]  (%p1477_p9), %s1092_s8, 2048, %s1094_s9, %s1077_s15, %s1404_s19, %s1404_s19, %s1405_s30  }
 0x317 PF: > { %s1108_s4 = sand.u32 1, %s1375_s12   ;;  %p1207_p0 = pnand %p1184_p12, %p1484_p11 }
 0x318   : > { %s1109_s5 = scalar_lea.sflag [#allocation5], %s1108_s4 }
 0x319   : > { %p1208_p1 = pneg %p1207_p0 }
 0x31b   : > { %1370 = dma.done.wait (%p1208_p1), %s1109_s5, 2048  }
 0x31c   : > { %1372 = vsyncadd (%p1208_p1), %s1109_s5, 4294965248  ;;  %s19_s17 = sadd.s32 1, %s1395_s17   ;;  %s1955_s12 = smov %s1379_s13 }
 0x31d   : > { %p16_p2 = scmp.ge.s32.totalorder %s19_s17, 4   ;;  %s1956_s13 = smov %s1383_s14 }
 0x31e   : > { %s1957_s14 = smov %s1482_s26  ;;  %s1958_s15 = smov %s1391_s16 }
 0x31f   : > { %s1959_s16 = smov %s1961_s20  ;;  %18 = sbr.rel (!%p16_p2) target bundleno = 6 (0x6), region = 140 }
 0x324   :  { %1115 = vsyncpa [#allocation4], 1 }
 0x325   :  { %1117 = vsyncpa [#allocation4 + $0x1], 1 }
 0x326   :  { %1118 = vsyncpa [#allocation5], 1 }
 0x327   :  { %1120 = vsyncpa [#allocation5 + $0x1], 1 }

</bundles_post_ra>
